<compile_context>
chip_gen: v7x
topology: tpu7x:2x2x1
jax: 0.10.0
libtpu: 0.0.40
codegen_flags: <defaults>
</compile_context>

<pallas_src>
import functools

import jax
import jax.numpy as jnp
from jax.experimental import pallas as pl
from jax.experimental.pallas import tpu as pltpu


# ---------------------------------------------------------------------------
# Kernels
# ---------------------------------------------------------------------------

def _adain_fused_kernel(gb_ref, x_ref, o_ref, *, eps, inv_hw):
    """Single-pass kernel: one block spans the full (padded) spatial extent.

    gb_ref : (1, C_TILE, 2) f32  -- [..., 0] = 1 + gamma, [..., 1] = beta
    x_ref  : (1, C_TILE, HW)
    o_ref  : (1, C_TILE, HW)
    """
    x = x_ref[...].astype(jnp.float32)
    s1 = jnp.sum(x, axis=-1, keepdims=True)
    s2 = jnp.sum(x * x, axis=-1, keepdims=True)
    mean = s1 * inv_hw
    var = jnp.maximum(s2 * inv_hw - mean * mean, 0.0)     # guard cancellation
    inv_std = jax.lax.rsqrt(var + eps)
    # out = (1+gamma) * (x - mean) * inv_std + beta  ==  x * scale + shift
    scale = gb_ref[:, :, 0:1] * inv_std
    shift = gb_ref[:, :, 1:2] - mean * scale
    o_ref[...] = (x * scale + shift).astype(o_ref.dtype)


def _adain_tiled_kernel(gb_ref, x_ref, o_ref, s1_ref, s2_ref, *,
                        eps, inv_hw, n_hw_tiles):
    """Two-sweep kernel over the HW axis (grid axis 2 runs 2*n_hw_tiles steps).

    Sweep 1 (k <  n_hw_tiles): accumulate sum / sum-of-squares into scratch.
    Sweep 2 (k >= n_hw_tiles): normalize + affine FMA, stream the output.
    """
    k = pl.program_id(2)

    @pl.when(k == 0)
    def _():
        s1_ref[...] = jnp.zeros_like(s1_ref)
        s2_ref[...] = jnp.zeros_like(s2_ref)

    @pl.when(k < n_hw_tiles)
    def _():
        x = x_ref[...].astype(jnp.float32)
        s1_ref[...] += jnp.sum(x, axis=-1, keepdims=True)
        s2_ref[...] += jnp.sum(x * x, axis=-1, keepdims=True)

    @pl.when(k == n_hw_tiles)
    def _():
        mean = s1_ref[...] * inv_hw
        var = jnp.maximum(s2_ref[...] * inv_hw - mean * mean, 0.0)
        inv_std = jax.lax.rsqrt(var + eps)
        scale = gb_ref[:, :, 0:1] * inv_std
        shift = gb_ref[:, :, 1:2] - mean * scale
        s1_ref[...] = scale       # reuse scratch: carries scale for sweep 2
        s2_ref[...] = shift       #                carries shift for sweep 2

    @pl.when(k >= n_hw_tiles)
    def _():
        x = x_ref[...].astype(jnp.float32)
        o_ref[...] = (x * s1_ref[...] + s2_ref[...]).astype(o_ref.dtype)


# ---------------------------------------------------------------------------
# Tiling plan
# ---------------------------------------------------------------------------

def _sublane_granule(dtype):
    itemsize = jnp.dtype(dtype).itemsize
    return {4: 8, 2: 16, 1: 32}.get(itemsize, 8)


def _divisors_step(total, step):
    return [t for t in range(step, total + 1, step) if total % t == 0]


def _plan_tiling(n, c, hw_p, dtype, target_bytes):
    """Returns (c_tile, hw_chunk, n_hw_tiles)."""
    itemsize = jnp.dtype(dtype).itemsize
    granule = _sublane_granule(dtype)
    c_divs = _divisors_step(c, granule) if c % granule == 0 else [c]

    # Prefer a single-pass block covering the full (padded) spatial extent.
    single = [t for t in c_divs if t * hw_p * itemsize <= target_bytes]
    if single:
        c_tile = max(single)
        # v7x megacore: keep >= 4 grid steps when it costs nothing.
        while n * (c // c_tile) < 4:
            smaller = [t for t in c_divs if t < c_tile]
            if not smaller:
                break
            c_tile = max(smaller)
        return c_tile, hw_p, 1

    # Large feature map: tile the spatial axis (two-sweep kernel).
    fit_c = [t for t in c_divs if t * 128 * itemsize <= target_bytes]
    c_tile = max(fit_c) if fit_c else min(c_divs)
    hw_divs = _divisors_step(hw_p, 128)
    fit_hw = [t for t in hw_divs if c_tile * t * itemsize <= target_bytes]
    hw_chunk = max(fit_hw) if fit_hw else min(hw_divs)
    return c_tile, hw_chunk, hw_p // hw_chunk


# ---------------------------------------------------------------------------
# Wrapper
# ---------------------------------------------------------------------------

def ada_instance_norm(x, s, fc_weight, fc_bias, *, eps=1e-5,
                      block_target_bytes=4 * 1024 * 1024):
    """x: (N, C, H, W), s: (N, style_dim).
    fc_weight: (2C, style_dim) (PyTorch Linear layout), fc_bias: (2C,)."""
    n, c, h, w = x.shape
    hw = h * w
    # Pad spatial axis to a multiple of 128 so loads/stores are lane-dense.
    hw_p = ((hw + 127) // 128) * 128

    # --- style MLP hoisted to XLA; fuse (1+gamma, beta) into one input -----
    h_style = (s.astype(jnp.float32) @ fc_weight.astype(jnp.float32).T
               + fc_bias.astype(jnp.float32))                    # (N, 2C)
    gb = jnp.stack([1.0 + h_style[:, :c], h_style[:, c:]], axis=-1)  # (N,C,2)

    x_flat = x.reshape(n, c, hw)
    if hw_p != hw:
        x_flat = jnp.pad(x_flat, ((0, 0), (0, 0), (0, hw_p - hw)))

    c_tile, hw_chunk, n_hw_tiles = _plan_tiling(
        n, c, hw_p, x.dtype, block_target_bytes)
    n_c_tiles = c // c_tile

    itemsize = jnp.dtype(x.dtype).itemsize
    tile_elems = c_tile * hw_chunk
    # VMEM budget: double-buffered in + out tiles, ~3 f32 temporaries
    # (x upcast, x*x, output expression), plus margin; cap at 48 MiB to
    # leave compiler headroom on v7x's 64 MiB VMEM.
    budget = 4 * tile_elems * itemsize + 3 * tile_elems * 4 + (2 << 20)
    vmem_limit = int(min(max(budget, 16 << 20), 48 << 20))

    inv_hw = 1.0 / hw   # true H*W (zero padding does not perturb sums)

    if n_hw_tiles == 1:
        kernel = functools.partial(_adain_fused_kernel, eps=eps, inv_hw=inv_hw)
        grid = (n, n_c_tiles)
        in_specs = [
            pl.BlockSpec((1, c_tile, 2), lambda i, j: (i, j, 0)),          # gb
            pl.BlockSpec((1, c_tile, hw_chunk), lambda i, j: (i, j, 0)),   # x
        ]
        out_specs = pl.BlockSpec((1, c_tile, hw_chunk), lambda i, j: (i, j, 0))
        scratch = []
        semantics = ("parallel", "parallel")
    else:
        kernel = functools.partial(_adain_tiled_kernel, eps=eps,
                                   inv_hw=inv_hw, n_hw_tiles=n_hw_tiles)
        grid = (n, n_c_tiles, 2 * n_hw_tiles)
        in_specs = [
            pl.BlockSpec((1, c_tile, 2), lambda i, j, k: (i, j, 0)),       # gb
            pl.BlockSpec(                                                  # x
                (1, c_tile, hw_chunk),
                lambda i, j, k: (i, j,
                                 jnp.where(k < n_hw_tiles, k, k - n_hw_tiles))),
        ]
        # Pin the output block to chunk 0 during the stats sweep so each
        # output block is written back exactly once (during sweep 2).
        out_specs = pl.BlockSpec(
            (1, c_tile, hw_chunk),
            lambda i, j, k: (i, j, jnp.maximum(k - n_hw_tiles, 0)))
        scratch = [pltpu.VMEM((1, c_tile, 1), jnp.float32),   # s1 -> scale
                   pltpu.VMEM((1, c_tile, 1), jnp.float32)]   # s2 -> shift
        semantics = ("parallel", "parallel", "arbitrary")

    out_flat = pl.pallas_call(
        kernel,
        out_shape=jax.ShapeDtypeStruct((n, c, hw_p), x.dtype),
        grid_spec=pltpu.PrefetchScalarGridSpec(
            num_scalar_prefetch=0,
            grid=grid,
            in_specs=in_specs,
            out_specs=out_specs,
            scratch_shapes=scratch,
        ),
        compiler_params=pltpu.CompilerParams(
            dimension_semantics=semantics,
            vmem_limit_bytes=vmem_limit),
    )(gb, x_flat)

    if hw_p != hw:
        out_flat = out_flat[:, :, :hw]
    return out_flat.reshape(n, c, h, w)


# ---------------------------------------------------------------------------
# Reference & test
# ---------------------------------------------------------------------------

def _reference(x, s, fc_weight, fc_bias, eps=1e-5):
    """Pure-JAX reference mirroring the PyTorch forward."""
    h = s @ fc_weight.T + fc_bias                       # (N, 2C)
    c = x.shape[1]
    gamma = h[:, :c][:, :, None, None]
    beta = h[:, c:][:, :, None, None]
    mean = jnp.mean(x, axis=(2, 3), keepdims=True)
    var = jnp.mean(jnp.square(x - mean), axis=(2, 3), keepdims=True)
    xn = (x - mean) / jnp.sqrt(var + eps)
    return (1.0 + gamma) * xn + beta


if __name__ == "__main__":
    key = jax.random.PRNGKey(0)
    k_x, k_s, k_w, k_b, k_x2, k_s2, k_w2, k_b2 = jax.random.split(key, 8)

    # ---- test 1: small shape, fused single-pass path ----------------------
    batch, channels, spatial, style_dim = 2, 4, 16, 32
    x = jax.random.normal(k_x, (batch, channels, spatial, spatial), jnp.float32)
    s = jax.random.normal(k_s, (batch, style_dim), jnp.float32)
    bound = 1.0 / (style_dim ** 0.5)
    fc_weight = jax.random.uniform(
        k_w, (2 * channels, style_dim), jnp.float32, -bound, bound)
    fc_bias = jax.random.uniform(
        k_b, (2 * channels,), jnp.float32, -bound, bound)

    out = jax.block_until_ready(ada_instance_norm(x, s, fc_weight, fc_bias))
    ref = _reference(x, s, fc_weight, fc_bias)
    assert out.shape == (batch, channels, spatial, spatial)
    assert jnp.allclose(out, ref, atol=1e-4, rtol=1e-4)

    # ---- test 2: non-128-multiple HW + forced HW-tiled two-sweep path -----
    b2, c2, h2, w2 = 1, 16, 18, 18           # HW = 324 -> padded to 384
    x2 = jax.random.normal(k_x2, (b2, c2, h2, w2), jnp.float32)
    s2 = jax.random.normal(k_s2, (b2, style_dim), jnp.float32)
    fc_w2 = jax.random.uniform(
        k_w2, (2 * c2, style_dim), jnp.float32, -bound, bound)
    fc_b2 = jax.random.uniform(
        k_b2, (2 * c2,), jnp.float32, -bound, bound)

    out2 = jax.block_until_ready(
        ada_instance_norm(x2, s2, fc_w2, fc_b2,
                          block_target_bytes=8 * 1024))   # force HW tiling
    ref2 = _reference(x2, s2, fc_w2, fc_b2)
    assert out2.shape == (b2, c2, h2, w2)
    assert jnp.allclose(out2, ref2, atol=1e-4, rtol=1e-4)

    print("KERNEL_OK")
</pallas_src>

<mosaic_0001>
module attributes {stable_mosaic.version = 11 : i64} {
  func.func @_adain_fused_kernel(%arg0: i32, %arg1: i32, %arg2: memref<1x4x2xf32, #tpu.memory_space<vmem>>, %arg3: memref<1x4x256xf32, #tpu.memory_space<vmem>>, %arg4: memref<1x4x256xf32, #tpu.memory_space<vmem>>) attributes {dimension_semantics = [#tpu.dimension_semantics<parallel>, #tpu.dimension_semantics<parallel>], iteration_bounds = array<i64: 2, 1>, scalar_prefetch = 0 : i64, scratch_operands = 0 : i64, tpu.core_type = #tpu.core_type<tc>, window_params = [{transform_indices = @transform_0, window_bounds = array<i64: 1, 4, 2>}, {transform_indices = @transform_1, window_bounds = array<i64: 1, 4, 256>}, {transform_indices = @transform_2, window_bounds = array<i64: 1, 4, 256>}]} {
    %c0 = arith.constant 0 : index
    %c0_0 = arith.constant 0 : index
    %c0_1 = arith.constant 0 : index
    %0 = vector.load %arg3[%c0, %c0_0, %c0_1] : memref<1x4x256xf32, #tpu.memory_space<vmem>>, vector<1x4x256xf32>
    %cst = arith.constant dense<0.000000e+00> : vector<1x4xf32>
    %1 = vector.multi_reduction <add>, %0, %cst [2] : vector<1x4x256xf32> to vector<1x4xf32>
    %2 = vector.shape_cast %1 : vector<1x4xf32> to vector<1x4x1xf32>
    %3 = arith.mulf %0, %0 : vector<1x4x256xf32>
    %cst_2 = arith.constant dense<0.000000e+00> : vector<1x4xf32>
    %4 = vector.multi_reduction <add>, %3, %cst_2 [2] : vector<1x4x256xf32> to vector<1x4xf32>
    %5 = vector.shape_cast %4 : vector<1x4xf32> to vector<1x4x1xf32>
    %cst_3 = arith.constant 3.906250e-03 : f32
    %6 = vector.broadcast %cst_3 : f32 to vector<1x4x1xf32>
    %7 = arith.mulf %2, %6 : vector<1x4x1xf32>
    %cst_4 = arith.constant 3.906250e-03 : f32
    %8 = vector.broadcast %cst_4 : f32 to vector<1x4x1xf32>
    %9 = arith.mulf %5, %8 : vector<1x4x1xf32>
    %10 = arith.mulf %7, %7 : vector<1x4x1xf32>
    %11 = arith.subf %9, %10 : vector<1x4x1xf32>
    %cst_5 = arith.constant 0.000000e+00 : f32
    %12 = vector.broadcast %cst_5 : f32 to vector<1x4x1xf32>
    %13 = arith.maximumf %11, %12 : vector<1x4x1xf32>
    %cst_6 = arith.constant 9.99999974E-6 : f32
    %14 = vector.broadcast %cst_6 : f32 to vector<1x4x1xf32>
    %15 = arith.addf %13, %14 : vector<1x4x1xf32>
    %16 = math.rsqrt %15 : vector<1x4x1xf32>
    %c0_7 = arith.constant 0 : index
    %c0_8 = arith.constant 0 : index
    %c0_9 = arith.constant 0 : index
    %17 = vector.load %arg2[%c0_7, %c0_8, %c0_9] : memref<1x4x2xf32, #tpu.memory_space<vmem>>, vector<1x4x1xf32>
    %18 = arith.mulf %17, %16 : vector<1x4x1xf32>
    %c0_10 = arith.constant 0 : index
    %c0_11 = arith.constant 0 : index
    %c1 = arith.constant 1 : index
    %19 = vector.load %arg2[%c0_10, %c0_11, %c1] : memref<1x4x2xf32, #tpu.memory_space<vmem>>, vector<1x4x1xf32>
    %20 = arith.mulf %7, %18 : vector<1x4x1xf32>
    %21 = arith.subf %19, %20 : vector<1x4x1xf32>
    %22 = vector.broadcast %18 : vector<1x4x1xf32> to vector<1x4x256xf32>
    %23 = arith.mulf %0, %22 : vector<1x4x256xf32>
    %24 = vector.broadcast %21 : vector<1x4x1xf32> to vector<1x4x256xf32>
    %25 = arith.addf %23, %24 : vector<1x4x256xf32>
    %c0_12 = arith.constant 0 : index
    %c0_13 = arith.constant 0 : index
    %c0_14 = arith.constant 0 : index
    %26 = vector.load %arg4[%c0_12, %c0_13, %c0_14] : memref<1x4x256xf32, #tpu.memory_space<vmem>>, vector<1x4x256xf32>
    tpu.vector_store %arg4[%c0_12, %c0_13, %c0_14], %25 {strides = array<i32>} : memref<1x4x256xf32, #tpu.memory_space<vmem>>, vector<1x4x256xf32>,
    return
  }
  func.func @transform_0(%arg0: i32, %arg1: i32) -> (i32, i32, i32) {
    %c0_i32 = arith.constant 0 : i32
    %c0_i32_0 = arith.constant 0 : i32
    return %arg0, %arg1, %c0_i32 : i32, i32, i32
  }
  func.func @transform_1(%arg0: i32, %arg1: i32) -> (i32, i32, i32) {
    %c0_i32 = arith.constant 0 : i32
    %c0_i32_0 = arith.constant 0 : i32
    return %arg0, %arg1, %c0_i32 : i32, i32, i32
  }
  func.func @transform_2(%arg0: i32, %arg1: i32) -> (i32, i32, i32) {
    %c0_i32 = arith.constant 0 : i32
    %c0_i32_0 = arith.constant 0 : i32
    return %arg0, %arg1, %c0_i32 : i32, i32, i32
  }
}

</mosaic_0001>

<bundles_post_ra>
// kernel: tpu_custom_call.1
= control target key start
LH: loop header
LB: loop body
LE: loop exit
PB: predicated region body
PF: predicated region fallthrough
CT: control target
= control target key end

     0   :  { %7 = vsyncpa [#allocation3], 0  ;;  %s788_s0 = inlined_call_operand.vmem [shape: f32[2,4,2], index: 0, kind: input, shape index: {}]   ;;  %s789_s1 = inlined_call_operand.hbm [shape: f32[2,4,256], index: 1, kind: input, shape index: {}]   ;;  %s790_s2 = inlined_call_operand.hbm [shape: f32[2,4,256], index: 2, kind: output, shape index: {}]  }
   0x1   :  { %9 = vsyncpa [#allocation3 + $0x1], 0 }
   0x2   :  { %10 = vsyncpa [#allocation4], 0 }
   0x3   :  { %12 = vsyncpa [#allocation4 + $0x1], 0  ;;  %s607_s9 = smov 0   ;;  %s609_s10 = smov 0  }
   0x4   :  { %s611_s11 = smov 0   ;;  %s613_s12 = smov 0  }
   0x5   :  { %s615_s13 = smov 0   ;;  %s617_s14 = smov 0  }
   0x6 LB: > { %s383_s15 = sadd.s32 4294967295, %s584_s14   ;;  %s384_s16 = sadd.s32 4294967294, %s584_s14   ;;  %s584_s14 = sphi %s617_s14, %s18_s14   ;;  %s580_s13 = sphi %s615_s13, %s806_s13   ;;  %s576_s12 = sphi %s613_s12, %s805_s12   ;;  %s572_s11 = sphi %s611_s11, %s804_s11   ;;  %s568_s10 = sphi %s609_s10, %s803_s10   ;;  %s564_s9 = sphi %s607_s9, %s802_s9  }
   0x7   : > { %s30_s17 = sadd.s32 1, %s580_s13  ;;  %s67_s18 = sadd.s32 1, %s572_s11 }
   0x8   : > { %p32_p0 = scmp.ge.s32.totalorder %s30_s17, 2  ;;  %p74_p1 = scmp.ne.s32.totalorder %s572_s11, %s568_s10 }
   0x9   : > { %p75_p2 = scmp.eq.s32.totalorder %s584_s14, 0  ;;  %p80_p3 = scmp.ne.s32.totalorder %s568_s10, %s564_s9 }
   0xa   : > { %s808_s17 = smov (%p32_p0, %s30_s17), 0  ;;  %p81_p5 = scmp.eq.s32.totalorder %s383_s15, 0 }
   0xb   : > { %p648_p4 = por %p75_p2, %p74_p1  ;;  %s62_s20 = ssub.s32 %s580_s13, %s808_s17 }
   0xc   : > { %p106_p6 = scmp.eq.s32.totalorder %s383_s15, 1  ;;  %p65_p7 = scmp.eq.s32.totalorder %s62_s20, 0 }
   0xd   : > { %p654_p8 = por %p81_p5, %p80_p3  ;;  %p112_p10 = scmp.eq.s32.totalorder %s384_s16, 1 }
   0xe   : > { %p658_p9 = por %p106_p6, %p74_p1  ;;  %p413_p13 = scmp.lt.s32.totalorder %s584_s14, 2 }
   0xf   : > { %s663_s23 = scalar_select %p65_p7, %s572_s11, %s67_s18  }
  0x10   : > { %s794_s22 = scalar_select %p658_p9, 1, 0 }
  0x11   : > { %p665_p11 = por %p112_p10, %p80_p3  ;;  %s142_s25 = sand.u32 1, %s572_s11  }
  0x12   : > { %s387_s26 = sshll.u32 %s142_s25, 3  ;;  %s399_s27 = sshll.u32 %s580_s13, 7 }
  0x13   : > { %s795_s24 = scalar_select %p665_p11, 1, 0 }
  0x14   : > { %s676_s30 = scalar_lea.hbm %s789_s1, %s399_s27  ;;  %s146_s3 = scalar_lea.vmem [#allocation2], %s387_s26 }
  0x15   : > { %s156_s4 = sshll.u32 %s146_s3, 4  ;;  %p682_p0 = pnand %p413_p13, %p648_p4  ;;  %s678_s4 = int_to_ptr.vmem [resolvable:$true] %s156_s4 }
  0x16   : > { %s143_s6 = scalar_lea.sflag [#allocation3], %s142_s25  ;;  %s472_s7 = scalar_lea.hbm %s676_s30, 128 }
  0x17   : > { %p473_p3 = scmp.ne.s32.totalorder %s676_s30, %s472_s7  ;;  %p474_p5 = pneg %p682_p0 }
  0x18   : > { %s477_s16 = scalar_lea.hbm %s789_s1, 256  ;;  %p478_p4 = scmp.lt.u32.totalorder %s676_s30, %s789_s1 }
  0x19   : > { %p475_p6 = pnand %p474_p5, %p473_p3  ;;  %p479_p10 = scmp.lt.u32.totalorder %s477_s16, %s472_s7 }
  0x1a   : > { %p481_p12 = scmp.lt.u32.totalorder %s472_s7, %s676_s30 }
  0x1b   : > { %p476_p7 = pneg %p475_p6  ;;  %p480_p13 = por %p479_p10, %p478_p4 }
  0x1d   : > { %p482_p1 = por %p481_p12, %p480_p13 }
  0x1f   : > { %p483_p2 = pnand %p482_p1, %p476_p7 }
  0x21   : > { %486 = shalt.err (!%p483_p2)
}
  0x22   : > { %s487_s20 = scalar_lea.vmem %s678_s4, 128  ;;  %s586_s25 = smov [#allocation2]  }
  0x23   : > { %p488_p3 = scmp.ne.s32.totalorder %s678_s4, %s487_s20  ;;  %s492_s26 = sshll.u32 %s586_s25, 4  ;;  %s493_s26 = int_to_ptr.vmem [resolvable:$false] %s492_s26 }
  0x24   : > { %s494_s27 = scalar_lea.vmem %s493_s26, 256  ;;  %p495_p9 = scmp.lt.s32.totalorder %s678_s4, %s493_s26 }
  0x25   : > { %p490_p6 = pnand %p488_p3, %p474_p5  ;;  %p496_p4 = scmp.lt.s32.totalorder %s494_s27, %s487_s20 }
  0x27   : > { %p491_p11 = pneg %p490_p6  ;;  %p497_p10 = por %p496_p4, %p495_p9 }
  0x29   : > { %p498_p12 = pnand %p497_p10, %p491_p11 }
  0x2b   : > { %501 = shalt.err (!%p498_p12)
}
  0x2c   : > { %408 = dma.hbm_to_vmem [thread:$0]  (!%p682_p0), %s676_s30, 128, %s678_s4, %s143_s6  }
  0x2d   : > { %p797_p1 = scmp.lt.s32.totalorder %s584_s14, 3  ;;  %p798_p2 = scmp.ge.s32.totalorder %s584_s14, 1 }
  0x2f   : > { %p162_p5 = pnand %p798_p2, %p797_p1 }
  0x30   : > { %s718_s28 = sand.u32 (!%p162_p5), 1, %s568_s10  }
  0x31   : > { %165 = sbr.rel (%p162_p5) target bundleno = 495 (0x1ef), region = 28  ;;  %s391_s29 = sshll.u32 (!%p162_p5), %s718_s28, 3 }
  0x32   : > { %s168_s3 = scalar_lea.sflag (!%p162_p5), [#allocation3], %s718_s28  ;;  %s171_s5 = scalar_lea.vmem (!%p162_p5), [#allocation2], %s391_s29 }
  0x38   : > { %555 = dma.done.wait (%p654_p8), %s168_s3, 128  }
  0x39   : > { %557 = vsyncadd (%p654_p8), %s168_s3, 4294967168  ;;  %vm210_vm0 = vcmask 1043456   ;;  %v206_v0 = vld [vmem:[%s171_s5] sm:$0xff]  ;;  %v587_v10 = vmov 0   ;;  %p199_p8 = scmp.lt.s32.totalorder %s576_s12, 1  ;;  %v588_v19 = vmov 1   ;;  %v247_v28 = vlaneseq }
  0x3a   : > { %v208_v1 = vcombine.high %v206_v0, %v206_v0  ;;  %v211_v2 = vsel %vm210_vm0, %v206_v0, 0.0  ;;  %v216_v3 = vmul.f32 %v206_v0, %v206_v0  ;;  %467 = vset.pattern.permute.xlu1 %v587_v10  ;;  %468 = vset.pattern.permute.xlu0 %v588_v19  ;;  %s589_s8 = smov 1   ;;  %v590_v26 = vmov 839922192   ;;  %s400_s15 = sshll.u32 %s576_s12, 7 }
  0x3b   : > { %s200_s21 = scalar_select %p199_p8, %s576_s12, 1  ;;  %v245_v27 = vunpack.c.l.s4 %v590_v26  ;;  %v248_v30 = vshrl.u32 %v247_v28, 7 }
  0x3c   : > { %v212_v4 = vsel %vm210_vm0, %v208_v1, 0.0  ;;  %v218_v5 = vcombine.high %v216_v3, %v216_v3  ;;  %v220_v6 = vsel %vm210_vm0, %v216_v3, 0.0  ;;  %s198_s16 = scalar_lea.vmem [#allocation5], %s391_s29  ;;  %s739_s25 = scalar_lea.hbm %s790_s2, %s400_s15 }
  0x3d   : > { %v213_v7 = vadd.f32 %v212_v4, %v211_v2  ;;  %s393_s30 = sshll.u32 %s200_s21, 2  ;;  %v246_v29 = vunpack.c.0.s8 %v245_v27  ;;  %s284_s18 = sshll.u32 %s198_s16, 4  ;;  %s741_s18 = int_to_ptr.vmem [resolvable:$true] %s284_s18 }
  0x3e   : > { %v221_v8 = vsel %vm210_vm0, %v218_v5, 0.0  ;;  %s205_s7 = scalar_lea.vmem %s788_s0, %s393_s30  ;;  %s268_s26 = scalar_lea.sflag [#allocation4], %s718_s28 }
  0x3f   : > { %214 = vadd.xlane.f32.xlu0 %v213_v7  ;;  %v222_v9 = vadd.f32 %v221_v8, %v220_v6  ;;  %v232_v20 = vld [vmem:[%s205_s7] sm:$0xf]  ;;  %v249_v31 = vsub.s32 %v246_v29, %v248_v30  ;;  %s502_s27 = scalar_lea.vmem %s741_s18, 128  ;;  %p799_p11 = scmp.ne.s32.totalorder %s794_s22, 0 }
  0x40   : > { %p503_p9 = scmp.ne.s32.totalorder %s741_s18, %s502_s27  ;;  %s591_s12 = smov [#allocation5]  }
  0x41   : > { %s506_s29 = sshll.u32 %s591_s12, 4  ;;  %s507_s29 = int_to_ptr.vmem [resolvable:$false] %s506_s29 }
  0x42   : > { %p504_p0 = pnand %p503_p9, %p799_p11  ;;  %s508_s3 = scalar_lea.vmem %s507_s29, 256 }
  0x43   : > { %223 = vadd.xlane.f32.xlu0 %v222_v9  ;;  %p509_p13 = scmp.lt.s32.totalorder %s741_s18, %s507_s29  ;;  %p510_p3 = scmp.lt.s32.totalorder %s508_s3, %s502_s27 }
  0x44   : > { %p505_p7 = pneg %p504_p0 }
  0x45   : > { %p511_p6 = por %p510_p3, %p509_p13 }
  0x47   : > { %p512_p4 = pnand %p511_p6, %p505_p7 }
  0xcc   : > { %v215_v11 = vpop.xlane.xlu0 %214 }
  0xcd   : > { %v225_v12 = vmul.f32 0.00390625, %v215_v11 }
  0xcf   : > { %v227_v14 = vmul.f32 %v225_v12, %v225_v12 }
  0xd0   : > { %v224_v13 = vpop.xlane.xlu0 %223 }
  0xd1   : > { %v226_v15 = vmul.f32 0.00390625, %v224_v13 }
  0xd3   : > { %v228_v16 = vsub.f32 %v226_v15, %v227_v14 }
  0xd5   : > { %v229_v17 = vmax.f32 %v228_v16, 0.0 }
  0xd7   : > { %v230_v18 = vadd.f32 1e-05, %v229_v17 }
  0xd9   : > { %470 = vrsqrt.f32 %v230_v18 }
  0xe3   : > { %v471_v21 = vpop.eup %470 }
  0xe4   : > { %v233_v22 = vmul.f32 %v471_v21, %v232_v20 }
  0xe6   : > { %v234_v23 = vmul.f32 %v233_v22, %v225_v12 }
  0xe8   : > { %236 = vrot.lane.b32.xlu1 %v234_v23, %s589_s8 }
  0xec   : > { %242 = vperm.xlu1 %467, %v233_v22  }
 0x15a   : > { %v237_v24 = vpop.permute.xlu1 %236 }
 0x15b   : > { %v239_v25 = vsub.f32 %v232_v20, %v237_v24 }
 0x15d   : > { %255 = vperm.xlu0 %468, %v239_v25  }
 0x16b   : > { %v243_v32 = vpop.permute.xlu1 %242 }
 0x16c   : > { %v250_v33 = vrot.slane %v243_v32, %v249_v31 }
 0x16e   : > { %v252_v35 = vmul.f32 %v250_v33, %v206_v0 }
 0x1dc   : > { %v256_v34 = vpop.permute.xlu0 %255 }
 0x1dd   : > { %v263_v36 = vrot.slane %v256_v34, %v249_v31 }
 0x1df   : > { %v265_v37 = vadd.f32 %v263_v36, %v252_v35 }
 0x1e1   : > { %266 = vst [vmem:[%s198_s16] sm:$0xff] %v265_v37 }
 0x1e2   : > { %515 = shalt.err (!%p512_p4)
}
 0x1e3   : > { %s516_s28 = scalar_lea.hbm %s739_s25, 128  ;;  %s520_s30 = scalar_lea.hbm %s790_s2, 256 }
 0x1e4   : > { %p517_p10 = scmp.ne.s32.totalorder %s739_s25, %s516_s28  ;;  %p521_p2 = scmp.lt.u32.totalorder %s739_s25, %s790_s2 }
 0x1e5   : > { %p522_p5 = scmp.lt.u32.totalorder %s520_s30, %s516_s28  ;;  %p524_p9 = scmp.lt.u32.totalorder %s516_s28, %s739_s25 }
 0x1e6   : > { %p518_p12 = pnand %p517_p10, %p799_p11 }
 0x1e7   : > { %p523_p8 = por %p522_p5, %p521_p2 }
 0x1e8   : > { %p519_p1 = pneg %p518_p12 }
 0x1e9   : > { %p525_p0 = por %p524_p9, %p523_p8 }
 0x1eb   : > { %p526_p7 = pnand %p525_p0, %p519_p1 }
 0x1ed   : > { %529 = shalt.err (!%p526_p7)
}
 0x1ee   : > { %403 = dma.vmem_to_hbm [thread:$0]  (%p799_p11), %s741_s18, 128, %s739_s25, %s268_s26  }
 0x1ef PF: > { %s296_s7 = sand.u32 1, %s564_s9   ;;  %p800_p13 = scmp.ne.s32.totalorder %s795_s24, 0 }
 0x1f0   : > { %p801_p3 = scmp.ge.s32.totalorder %s584_s14, 2  ;;  %s297_s8 = scalar_lea.sflag [#allocation4], %s296_s7 }
 0x1f2   : > { %p410_p6 = pnand %p801_p3, %p800_p13 }
 0x1f4   : > { %559 = dma.done.wait (!%p410_p6), %s297_s8, 128  }
 0x1f5   : > { %561 = vsyncadd (!%p410_p6), %s297_s8, 4294967168  ;;  %s18_s14 = sadd.s32 1, %s584_s14   ;;  %s802_s9 = smov %s568_s10 }
 0x1f6   : > { %p15_p4 = scmp.ge.s32.totalorder %s18_s14, 4   ;;  %s803_s10 = smov %s572_s11 }
 0x1f7   : > { %s804_s11 = smov %s663_s23  ;;  %s805_s12 = smov %s580_s13 }
 0x1f8   : > { %s806_s13 = smov %s808_s17  ;;  %17 = sbr.rel (!%p15_p4) target bundleno = 6 (0x6), region = 76 }
 0x1ff   :  { %302 = vsyncpa [#allocation3], 1 }
 0x200   :  { %304 = vsyncpa [#allocation3 + $0x1], 1 }
 0x201   :  { %305 = vsyncpa [#allocation4], 1 }
 0x202   :  { %307 = vsyncpa [#allocation4 + $0x1], 1 }

</bundles_post_ra>
